<compile_context>
chip_gen: v6e
topology: v6e:2x2x1
jax: 0.10.0
libtpu: 0.0.40
codegen_flags: <defaults>
</compile_context>

<pallas_src>
import jax
import jax.numpy as jnp
from jax.experimental import pallas as pl
from jax.experimental.pallas import tpu as pltpu

NUM_CLASSES = 20
SOFTMAX_EPS = 1e-5       # default eps of adf.Softmax.forward
LOSS_EPS = 1e-5          # eps argument of SoftmaxHeteroscedasticLoss.forward
KEEP_VAR_OFFSET = 0.001  # keep_variance_fn(x) = x + 0.001
MAX_TILE_P = 32768       # f32: ~2.5 MiB/input block; ~10.5 MiB double-buffered -> fits
                         # the default scoped-VMEM limit on v5e (16 MiB) / v6e / v7x.


def _round_up(x, m):
    return ((x + m - 1) // m) * m


def _pick_tile_p(hw, max_tile=MAX_TILE_P):
    """Lane-tile size: always a multiple of 128, <= max_tile.

    Prefers the largest multiple-of-128 divisor of hw (no masked tail); otherwise
    rounds up (or caps at max_tile) and the kernel masks the padded tail columns.
    """
    best = 0
    t = 128
    while t <= min(hw, max_tile):
        if hw % t == 0:
            best = t
        t += 128
    if best:
        return best
    return min(_round_up(hw, 128), max_tile)


def _make_loss_kernel(tile_p, hw):
    """Kernel over one (C, tile_p) pixel tile of one image -> (1, 128) loss partials."""
    num_fold = tile_p // 128
    needs_mask = (hw % tile_p) != 0

    def kernel(fm_ref, fv_ref, tgt_ref, out_ref):
        fm = fm_ref[...].astype(jnp.float32)             # (C, TP)
        fv = fv_ref[...].astype(jnp.float32)             # (C, TP)

        # --- adf.Softmax (log-normal approximation) ---
        e = jnp.exp(fm + 0.5 * fv)                       # exp(log_gaussian_mean)
        constant = jnp.sum(e, axis=0, keepdims=True) + SOFTMAX_EPS   # (1, TP)
        inv_c = 1.0 / constant                           # one divide per pixel column
        mean = e * inv_c
        # lg_var / c^2 == (e*inv_c)^2 * (exp(fv)-1) == mean^2 * (exp(fv)-1);
        # keep_variance offset and the loss eps are folded into one constant.
        var_eps = mean * mean * (jnp.exp(fv) - 1.0) + (KEEP_VAR_OFFSET + LOSS_EPS)

        # --- heteroscedastic NLL (one-hot built implicitly; 0.5 hoisted outside) ---
        tgt = tgt_ref[...]                               # (1, TP) int32
        cls = jax.lax.broadcasted_iota(jnp.int32, mean.shape, 0)
        diff = jnp.where(cls == tgt, 1.0 - mean, -mean)  # == onehot - mean
        elem = (diff * diff) / var_eps + jnp.log(var_eps)

        per_pixel = jnp.sum(elem, axis=0, keepdims=True)  # (1, TP)

        if needs_mask:  # padded tail columns of the last tile contribute nothing
            col = jax.lax.broadcasted_iota(jnp.int32, (1, tile_p), 1)
            valid = (pl.program_id(1) * tile_p + col) < hw
            per_pixel = jnp.where(valid, per_pixel, 0.0)

        # Fold the (1, TP) row down to lane-dense (1, 128) partials (sum-preserving).
        acc = per_pixel[:, 0:128]
        for i in range(1, num_fold):
            acc = acc + per_pixel[:, i * 128:(i + 1) * 128]
        out_ref[...] = acc                               # (1, 128), unmasked vst

    return kernel


@jax.jit
def softmax_heteroscedastic_loss(features_mean, features_variance, targets):
    """features_mean / features_variance: [N, C, H, W] f32 or bf16; targets: [N, H, W] int."""
    N, C, H, W = features_mean.shape
    assert C == NUM_CLASSES
    HW = H * W
    tile_p = _pick_tile_p(HW)
    num_tiles = pl.cdiv(HW, tile_p)

    # Free reshapes only (contiguous NCHW -> (N, C, HW)); dtype is left as given
    # (bf16 stays bf16 in HBM -> half the read bytes; kernel upcasts to f32).
    fm = features_mean.reshape(N, C, HW)
    fv = features_variance.reshape(N, C, HW)
    tgt = targets.astype(jnp.int32).reshape(N, 1, HW)

    in_bytes = (fm.size * fm.dtype.itemsize + fv.size * fv.dtype.itemsize
                + tgt.size * 4)
    out_bytes = N * num_tiles * 128 * 4
    cost = pl.CostEstimate(
        flops=15 * N * C * HW,
        transcendentals=3 * N * C * HW,
        bytes_accessed=in_bytes + out_bytes)

    partials = pl.pallas_call(
        _make_loss_kernel(tile_p, HW),
        out_shape=jax.ShapeDtypeStruct((N, 1, num_tiles * 128), jnp.float32),
        grid_spec=pltpu.PrefetchScalarGridSpec(
            num_scalar_prefetch=0,
            grid=(N, num_tiles),
            in_specs=[
                pl.BlockSpec((None, C, tile_p), lambda n, i: (n, 0, i)),
                pl.BlockSpec((None, C, tile_p), lambda n, i: (n, 0, i)),
                pl.BlockSpec((None, 1, tile_p), lambda n, i: (n, 0, i)),
            ],
            out_specs=pl.BlockSpec((None, 1, 128), lambda n, i: (n, 0, i)),
        ),
        compiler_params=pltpu.CompilerParams(
            dimension_semantics=("parallel", "parallel")),
        cost_estimate=cost,
    )(fm, fv, tgt)

    # torch.mean over all N*C*H*W elements; the 0.5 loss factor is folded in here.
    return jnp.sum(partials) * (0.5 / (N * C * HW))


def _reference_loss(fm, fv, targets):
    """Pure-JAX mirror of the PyTorch module, for verification (f32 math)."""
    fm = fm.astype(jnp.float32)
    fv = fv.astype(jnp.float32)
    lgm = fm + 0.5 * fv
    lgv = jnp.exp(2.0 * lgm) * (jnp.exp(fv) - 1.0)
    lgm = jnp.exp(lgm)
    constant = jnp.sum(lgm, axis=1, keepdims=True) + SOFTMAX_EPS
    mean = lgm / constant
    var = lgv / (constant ** 2) + KEEP_VAR_OFFSET
    onehot = jax.nn.one_hot(targets, NUM_CLASSES, dtype=jnp.float32)   # N,H,W,C
    onehot = jnp.transpose(onehot, (0, 3, 1, 2))                       # N,C,H,W
    precision = 1.0 / (var + LOSS_EPS)
    return jnp.mean(0.5 * precision * (onehot - mean) ** 2
                    + 0.5 * jnp.log(var + LOSS_EPS))


if __name__ == "__main__":
    key = jax.random.PRNGKey(0)
    k1, k2, k3 = jax.random.split(key, 3)

    N, C, H, W = 2, NUM_CLASSES, 16, 16
    # "outputs" of an ADF network: (mean logits, variance of logits)
    features_mean = jax.random.normal(k1, (N, C, H, W), dtype=jnp.float32)
    features_variance = jax.nn.softplus(
        jax.random.normal(k2, (N, C, H, W), dtype=jnp.float32))  # positive variances
    targets = jax.random.randint(k3, (N, H, W), 0, NUM_CLASSES, dtype=jnp.int32)

    # f32 path
    loss = jax.block_until_ready(
        softmax_heteroscedastic_loss(features_mean, features_variance, targets))
    ref = _reference_loss(features_mean, features_variance, targets)
    assert jnp.allclose(loss, ref, rtol=1e-4, atol=1e-5), (loss, ref)

    # bf16-input path (halves HBM read bytes; kernel math stays f32)
    fm_bf = features_mean.astype(jnp.bfloat16)
    fv_bf = features_variance.astype(jnp.bfloat16)
    loss_bf = jax.block_until_ready(
        softmax_heteroscedastic_loss(fm_bf, fv_bf, targets))
    ref_bf = _reference_loss(fm_bf.astype(jnp.float32),
                             fv_bf.astype(jnp.float32), targets)
    assert jnp.isfinite(loss_bf)
    assert jnp.allclose(loss_bf, ref_bf, rtol=1e-4, atol=1e-5), (loss_bf, ref_bf)

    # Odd spatial shape: exercises the masked-tail tile (H*W=130, not a multiple of 128)
    H2, W2 = 10, 13
    fm2 = jax.random.normal(k1, (N, C, H2, W2), dtype=jnp.float32)
    fv2 = jax.nn.softplus(jax.random.normal(k2, (N, C, H2, W2), dtype=jnp.float32))
    tgt2 = jax.random.randint(k3, (N, H2, W2), 0, NUM_CLASSES, dtype=jnp.int32)
    loss2 = jax.block_until_ready(softmax_heteroscedastic_loss(fm2, fv2, tgt2))
    ref2 = _reference_loss(fm2, fv2, tgt2)
    assert jnp.allclose(loss2, ref2, rtol=1e-4, atol=1e-5), (loss2, ref2)

    print("KERNEL_OK")
</pallas_src>

<mosaic_0001>
module attributes {stable_mosaic.version = 11 : i64} {
  func.func @kernel(%arg0: i32, %arg1: i32, %arg2: memref<1x20x256xf32, #tpu.memory_space<vmem>>, %arg3: memref<1x20x256xf32, #tpu.memory_space<vmem>>, %arg4: memref<1x1x256xi32, #tpu.memory_space<vmem>>, %arg5: memref<1x1x128xf32, #tpu.memory_space<vmem>>) attributes {dimension_semantics = [#tpu.dimension_semantics<parallel>, #tpu.dimension_semantics<parallel>], iteration_bounds = array<i64: 2, 1>, scalar_prefetch = 0 : i64, scratch_operands = 0 : i64, tpu.core_type = #tpu.core_type<tc>, window_params = [{transform_indices = @transform_0, window_bounds = array<i64: 1, 20, 256>}, {transform_indices = @transform_1, window_bounds = array<i64: 1, 20, 256>}, {transform_indices = @transform_2, window_bounds = array<i64: 1, 1, 256>}, {transform_indices = @transform_3, window_bounds = array<i64: 1, 1, 128>}]} {
    %c0 = arith.constant 0 : index
    %c0_0 = arith.constant 0 : index
    %c0_1 = arith.constant 0 : index
    %0 = vector.load %arg2[%c0, %c0_0, %c0_1] : memref<1x20x256xf32, #tpu.memory_space<vmem>>, vector<1x20x256xf32>
    %1 = vector.shape_cast %0 : vector<1x20x256xf32> to vector<20x256xf32>
    %c0_2 = arith.constant 0 : index
    %c0_3 = arith.constant 0 : index
    %c0_4 = arith.constant 0 : index
    %2 = vector.load %arg3[%c0_2, %c0_3, %c0_4] : memref<1x20x256xf32, #tpu.memory_space<vmem>>, vector<1x20x256xf32>
    %3 = vector.shape_cast %2 : vector<1x20x256xf32> to vector<20x256xf32>
    %cst = arith.constant 5.000000e-01 : f32
    %4 = vector.broadcast %cst : f32 to vector<20x256xf32>
    %5 = arith.mulf %4, %3 : vector<20x256xf32>
    %6 = arith.addf %1, %5 : vector<20x256xf32>
    %7 = math.exp %6 : vector<20x256xf32>
    %cst_5 = arith.constant dense<0.000000e+00> : vector<256xf32>
    %8 = vector.multi_reduction <add>, %7, %cst_5 [0] : vector<20x256xf32> to vector<256xf32>
    %9 = vector.shape_cast %8 : vector<256xf32> to vector<1x256xf32>
    %cst_6 = arith.constant 9.99999974E-6 : f32
    %10 = vector.broadcast %cst_6 : f32 to vector<1x256xf32>
    %11 = arith.addf %9, %10 : vector<1x256xf32>
    %cst_7 = arith.constant 1.000000e+00 : f32
    %12 = vector.broadcast %cst_7 : f32 to vector<1x256xf32>
    %13 = arith.divf %12, %11 : vector<1x256xf32>
    %14 = vector.broadcast %13 : vector<1x256xf32> to vector<20x256xf32>
    %15 = arith.mulf %7, %14 : vector<20x256xf32>
    %16 = arith.mulf %15, %15 : vector<20x256xf32>
    %17 = math.exp %3 : vector<20x256xf32>
    %cst_8 = arith.constant 1.000000e+00 : f32
    %18 = vector.broadcast %cst_8 : f32 to vector<20x256xf32>
    %19 = arith.subf %17, %18 : vector<20x256xf32>
    %20 = arith.mulf %16, %19 : vector<20x256xf32>
    %cst_9 = arith.constant 1.010000e-03 : f32
    %21 = vector.broadcast %cst_9 : f32 to vector<20x256xf32>
    %22 = arith.addf %20, %21 : vector<20x256xf32>
    %c0_10 = arith.constant 0 : index
    %c0_11 = arith.constant 0 : index
    %c0_12 = arith.constant 0 : index
    %23 = vector.load %arg4[%c0_10, %c0_11, %c0_12] : memref<1x1x256xi32, #tpu.memory_space<vmem>>, vector<1x1x256xi32>
    %24 = vector.shape_cast %23 : vector<1x1x256xi32> to vector<1x256xi32>
    %25 = tpu.iota {dimensions = array<i32: 0>} : vector<20x256xi32>
    %26 = vector.broadcast %24 : vector<1x256xi32> to vector<20x256xi32>
    %27 = arith.cmpi eq, %25, %26 : vector<20x256xi32>
    %cst_13 = arith.constant 1.000000e+00 : f32
    %28 = vector.broadcast %cst_13 : f32 to vector<20x256xf32>
    %29 = arith.subf %28, %15 : vector<20x256xf32>
    %cst_14 = arith.constant 0.000000e+00 : f32
    %30 = vector.broadcast %cst_14 : f32 to vector<20x256xf32>
    %31 = arith.subf %30, %15 : vector<20x256xf32>
    %32 = arith.select %27, %29, %31 : vector<20x256xi1>, vector<20x256xf32>
    %33 = arith.mulf %32, %32 : vector<20x256xf32>
    %34 = arith.divf %33, %22 : vector<20x256xf32>
    %35 = math.log %22 : vector<20x256xf32>
    %36 = arith.addf %34, %35 : vector<20x256xf32>
    %cst_15 = arith.constant dense<0.000000e+00> : vector<256xf32>
    %37 = vector.multi_reduction <add>, %36, %cst_15 [0] : vector<20x256xf32> to vector<256xf32>
    %38 = vector.shape_cast %37 : vector<256xf32> to vector<1x256xf32>
    %39 = vector.extract_strided_slice %38 {offsets = [0, 0], sizes = [1, 128], strides = [1, 1]} : vector<1x256xf32> to vector<1x128xf32>
    %40 = vector.extract_strided_slice %38 {offsets = [0, 128], sizes = [1, 128], strides = [1, 1]} : vector<1x256xf32> to vector<1x128xf32>
    %41 = arith.addf %39, %40 : vector<1x128xf32>
    %c0_16 = arith.constant 0 : index
    %c0_17 = arith.constant 0 : index
    %c0_18 = arith.constant 0 : index
    %42 = vector.load %arg5[%c0_16, %c0_17, %c0_18] : memref<1x1x128xf32, #tpu.memory_space<vmem>>, vector<1x1x128xf32>
    %43 = vector.shape_cast %42 : vector<1x1x128xf32> to vector<1x128xf32>
    %44 = vector.shape_cast %41 : vector<1x128xf32> to vector<1x1x128xf32>
    tpu.vector_store %arg5[%c0_16, %c0_17, %c0_18], %44 {strides = array<i32>} : memref<1x1x128xf32, #tpu.memory_space<vmem>>, vector<1x1x128xf32>,
    return
  }
  func.func @transform_0(%arg0: i32, %arg1: i32) -> (i32, i32, i32) {
    %c0_i32 = arith.constant 0 : i32
    %c0_i32_0 = arith.constant 0 : i32
    return %arg0, %c0_i32, %arg1 : i32, i32, i32
  }
  func.func @transform_1(%arg0: i32, %arg1: i32) -> (i32, i32, i32) {
    %c0_i32 = arith.constant 0 : i32
    %c0_i32_0 = arith.constant 0 : i32
    return %arg0, %c0_i32, %arg1 : i32, i32, i32
  }
  func.func @transform_2(%arg0: i32, %arg1: i32) -> (i32, i32, i32) {
    %c0_i32 = arith.constant 0 : i32
    %c0_i32_0 = arith.constant 0 : i32
    return %arg0, %c0_i32, %arg1 : i32, i32, i32
  }
  func.func @transform_3(%arg0: i32, %arg1: i32) -> (i32, i32, i32) {
    %c0_i32 = arith.constant 0 : i32
    %c0_i32_0 = arith.constant 0 : i32
    return %arg0, %c0_i32, %arg1 : i32, i32, i32
  }
}

</mosaic_0001>

<bundles_post_ra>
// kernel: softmax_heteroscedastic_loss.1
= control target key start
LH: loop header
LB: loop body
LE: loop exit
PB: predicated region body
PF: predicated region fallthrough
CT: control target
= control target key end

     0   :  { %s709_s12 = smov 0   ;;  %s711_s13 = smov 0   ;;  %s797_s0 = inlined_call_operand.vmem [shape: f32[2,20,256], index: 0, kind: input, shape index: {}]   ;;  %s798_s1 = inlined_call_operand.vmem [shape: f32[2,20,256], index: 1, kind: input, shape index: {}]   ;;  %s799_s2 = inlined_call_operand.vmem [shape: s32[2,1,256], index: 2, kind: input, shape index: {}]   ;;  %s800_s3 = inlined_call_operand.vmem [shape: f32[2,1,128], index: 3, kind: output, shape index: {}]  }
   0x1   :  { %s713_s14 = smov 0  }
   0x2 LB: > { %s25_s15 = sadd.s32 1, %s683_s13  ;;  %p576_p0 = scmp.ge.s32.totalorder %s687_s14, 1  ;;  %s687_s14 = sphi %s713_s14, %s13_s14   ;;  %s683_s13 = sphi %s711_s13, %s802_s13   ;;  %s679_s12 = sphi %s709_s12, %s801_s12  }
   0x3   : > { %p27_p1 = scmp.ge.s32.totalorder %s25_s15, 2  ;;  %p191_p2 = scmp.lt.s32.totalorder %s687_s14, 3 }
   0x5   : > { %s804_s15 = smov (%p27_p1, %s25_s15), 0  ;;  %p192_p3 = pnand %p576_p0, %p191_p2 }
   0x6   : > { %p238_p4 = scmp.lt.s32.totalorder (!%p192_p3), %s679_s12, 1 }
   0x7   : > { %195 = sbr.rel (%p192_p3) target bundleno = 129 (0x81), region = 32 }
   0xc   : > { %s806_s12 = smov (!%p238_p4, %s679_s12), 1  ;;  %vm309_vm0 = vcmask 1043456  }
   0xd   : > { %s588_s16 = smul.u32 48, %s806_s12  ;;  %s579_s23 = sshll.u32 %s806_s12, 1 }
   0xe   : > { %s264_s26 = scalar_lea.vmem %s799_s2, %s579_s23  ;;  %s271_s29 = scalar_lea.vmem %s800_s3, %s806_s12 }
   0xf   : > { %s245_s19 = scalar_lea.vmem %s797_s0, %s588_s16  ;;  %s255_s22 = scalar_lea.vmem %s798_s1, %s588_s16 }
  0x10   : > { %v272_v0 = vld [vmem:[%s245_s19] sm:$0xff]  ;;  %v273_v1 = vld [vmem:[%s245_s19 + $0x8] sm:$0xff]  ;;  %v274_v2 = vld [vmem:[%s245_s19 + $0x10] sm:$0xff] }
  0x11   : > { %v275_v3 = vld [vmem:[%s245_s19 + $0x18] sm:$0xff]  ;;  %v276_v4 = vld [vmem:[%s245_s19 + $0x20] sm:$0xf]  ;;  %v279_v6 = vld [vmem:[%s255_s22 + $0x8] sm:$0xff] }
  0x12   : > { %v278_v5 = vld [vmem:[%s255_s22] sm:$0xff]  ;;  %v280_v7 = vld [vmem:[%s255_s22 + $0x10] sm:$0xff]  ;;  %v281_v8 = vld [vmem:[%s255_s22 + $0x18] sm:$0xff]  ;;  %v285_v13 = vmul.f32 0.5, %v279_v6  ;;  %v347_v51 = vmul.f32 1.442695, %v279_v6 }
  0x13   : > { %v282_v9 = vld [vmem:[%s255_s22 + $0x20] sm:$0xf]  ;;  %v283_v10 = vld [vmem:[%s255_s22 + $0x28] sm:$0xf]  ;;  %v284_v11 = vmul.f32 0.5, %v278_v5  ;;  %v286_v14 = vmul.f32 0.5, %v280_v7 }
  0x14   : > { %v277_v12 = vld [vmem:[%s245_s19 + $0x28] sm:$0xf]  ;;  %v287_v15 = vmul.f32 0.5, %v281_v8  ;;  %v288_v16 = vmul.f32 0.5, %v282_v9  ;;  %v289_v17 = vmul.f32 0.5, %v283_v10  ;;  %v291_v19 = vadd.f32 %v285_v13, %v273_v1 }
  0x15   : > { %v290_v18 = vadd.f32 %v284_v11, %v272_v0  ;;  %v292_v20 = vadd.f32 %v286_v14, %v274_v2  ;;  %v345_v49 = vmul.f32 1.442695, %v278_v5  ;;  %v349_v53 = vmul.f32 1.442695, %v280_v7 }
  0x16   : > { %v293_v21 = vadd.f32 %v287_v15, %v275_v3  ;;  %v294_v22 = vadd.f32 %v288_v16, %v276_v4  ;;  %v295_v23 = vadd.f32 %v289_v17, %v277_v12  ;;  %v298_v25 = vmul.f32 1.442695, %v291_v19 }
  0x17   : > { %v296_v24 = vmul.f32 1.442695, %v290_v18  ;;  %v300_v26 = vmul.f32 1.442695, %v292_v20  ;;  %v351_v55 = vmul.f32 1.442695, %v281_v8  ;;  %v376_v20 = vlaneseq }
  0x18   : > { %v302_v27 = vmul.f32 1.442695, %v293_v21  ;;  %v304_v28 = vmul.f32 1.442695, %v294_v22  ;;  %v306_v29 = vmul.f32 1.442695, %v295_v23 }
  0x19   : > { %613 = vpow2.f32 %v296_v24  ;;  %v353_v59 = vmul.f32 1.442695, %v282_v9  ;;  %v355_v61 = vmul.f32 1.442695, %v283_v10 }
  0x1a   : > { %615 = vpow2.f32 %v298_v25 }
  0x1b   : > { %617 = vpow2.f32 %v300_v26 }
  0x1c   : > { %619 = vpow2.f32 %v302_v27 }
  0x1d   : > { %621 = vpow2.f32 %v304_v28 }
  0x1e   : > { %623 = vpow2.f32 %v306_v29  ;;  %v377_v29 = vshrl.u32 %v376_v20, 7 }
  0x1f   : > { %625 = vpow2.f32 %v345_v49 }
  0x20   : > { %627 = vpow2.f32 %v347_v51 }
  0x21   : > { %629 = vpow2.f32 %v349_v53 }
  0x22   : > { %631 = vpow2.f32 %v351_v55 }
  0x26   : > { %v614_v30 = vpop.eup %613 }
  0x27   : > { %v616_v31 = vpop.eup %615 }
  0x28   : > { %v618_v32 = vpop.eup %617 }
  0x29   : > { %v620_v33 = vpop.eup %619  ;;  %v308_v34 = vadd.f32 %v618_v32, %v614_v30 }
  0x2a   : > { %v622_v35 = vpop.eup %621  ;;  %v318_v36 = vadd.f32 %v620_v33, %v616_v31 }
  0x2b   : > { %v624_v37 = vpop.eup %623  ;;  %v310_v38 = vsel %vm309_vm0, %v622_v35, 0.0 }
  0x2c   : > { %v311_v39 = vadd.f32 %v310_v38, %v308_v34  ;;  %v319_v40 = vsel %vm309_vm0, %v624_v37, 0.0  ;;  %v626_v62 = vpop.eup %625  ;;  %v375_v38 = vld [vmem:[%s264_s26] sm:$0x3] }
  0x2d   : > { %v320_v41 = vadd.f32 %v319_v40, %v318_v36  ;;  %v628_v63 = vpop.eup %627  ;;  %v580_v7 = vadd.f32 -1.0, %v626_v62  ;;  %v382_v36 = vsub.s32 0, %v377_v29 }
  0x2e   : > { %v312_v42 = vrot.slane %v311_v39, 4  ;;  %v630_v0 = vpop.eup %629  ;;  %v581_v12 = vadd.f32 -1.0, %v628_v63 }
  0x2f   : > { %v321_v43 = vrot.slane %v320_v41, 4  ;;  %v632_v1 = vpop.eup %631  ;;  %v582_v16 = vadd.f32 -1.0, %v630_v0 }
  0x30   : > { %v313_v44 = vadd.f32 %v312_v42, %v311_v39  ;;  %v583_v19 = vadd.f32 -1.0, %v632_v1  ;;  %v386_v39 = vsub.s32 1, %v377_v29 }
  0x31   : > { %v322_v45 = vadd.f32 %v321_v43, %v320_v41  ;;  %v383_v41 = vrot.slane %v375_v38, %v382_v36  ;;  %v378_v43 = vadd.s32 8, %v377_v29 }
  0x32   : > { %v314_v46 = vrot.slane %v313_v44, 2  ;;  %v387_v42 = vrot.slane %v375_v38, %v386_v39 }
  0x33   : > { %v323_v47 = vrot.slane %v322_v45, 2  ;;  %vm388_vm1 = vcmp.eq.s32.totalorder %v377_v29, %v383_v41  ;;  %vm390_vm3 = vcmp.eq.s32.totalorder %v378_v43, %v383_v41 }
  0x34   : > { %v315_v48 = vadd.f32 %v314_v46, %v313_v44  ;;  %v379_v44 = vadd.s32 16, %v377_v29  ;;  %vm389_vm2 = vcmp.eq.s32.totalorder %v377_v29, %v387_v42  ;;  %vm391_vm4 = vcmp.eq.s32.totalorder %v378_v43, %v387_v42 }
  0x35   : > { %v324_v50 = vadd.f32 %v323_v47, %v322_v45 }
  0x36   : > { %v316_v52 = vrot.slane %v315_v48, 1  ;;  %vm392_vm5 = vcmp.eq.s32.totalorder %v379_v44, %v383_v41  ;;  %vm393_vm6 = vcmp.eq.s32.totalorder %v379_v44, %v387_v42 }
  0x37   : > { %v325_v54 = vrot.slane %v324_v50, 1 }
  0x38   : > { %v317_v56 = vadd.f32 %v316_v52, %v315_v48 }
  0x39   : > { %v326_v57 = vadd.f32 %v325_v54, %v324_v50 }
  0x3a   : > { %v327_v58 = vadd.f32 1e-05, %v317_v56 }
  0x3b   : > { %v328_v60 = vadd.f32 1e-05, %v326_v57 }
  0x3c   : > { %633 = vrcp.f32 %v327_v58 }
  0x3d   : > { %635 = vrcp.f32 %v328_v60 }
  0x3e   : > { %637 = vpow2.f32 %v353_v59 }
  0x3f   : > { %639 = vpow2.f32 %v355_v61 }
  0x49   : > { %v634_v2 = vpop.eup %633 }
  0x4a   : > { %v636_v3 = vpop.eup %635  ;;  %v738_v4 = vmul.f32 %v634_v2, %v614_v30  ;;  %v740_v5 = vmul.f32 %v634_v2, %v618_v32  ;;  %v742_v6 = vmul.f32 %v634_v2, %v622_v35 }
  0x4b   : > { %v638_v8 = vpop.eup %637  ;;  %v744_v9 = vmul.f32 %v636_v3, %v616_v31  ;;  %v746_v10 = vmul.f32 %v636_v3, %v620_v33  ;;  %v748_v11 = vmul.f32 %v636_v3, %v624_v37 }
  0x4c   : > { %v640_v13 = vpop.eup %639  ;;  %v339_v14 = vmul.f32 %v738_v4, %v738_v4  ;;  %v341_v15 = vmul.f32 %v740_v5, %v740_v5  ;;  %v343_v21 = vmul.f32 %v742_v6, %v742_v6  ;;  %v584_v22 = vadd.f32 -1.0, %v638_v8 }
  0x4d   : > { %v340_v17 = vmul.f32 %v744_v9, %v744_v9  ;;  %v342_v18 = vmul.f32 %v746_v10, %v746_v10  ;;  %v344_v24 = vmul.f32 %v748_v11, %v748_v11  ;;  %v585_v25 = vadd.f32 -1.0, %v640_v13 }
  0x4e   : > { %v363_v23 = vmul.f32 %v580_v7, %v339_v14  ;;  %v365_v27 = vmul.f32 %v582_v16, %v341_v15  ;;  %v367_v30 = vmul.f32 %v584_v22, %v343_v21  ;;  %v394_v45 = vsub.f32 1.0, %v738_v4 }
  0x4f   : > { %v364_v26 = vmul.f32 %v581_v12, %v340_v17  ;;  %v366_v28 = vmul.f32 %v583_v19, %v342_v18  ;;  %v368_v32 = vmul.f32 %v585_v25, %v344_v24  ;;  %v400_v46 = vsub.f32 0.0, %v738_v4 }
  0x50   : > { %v369_v31 = vadd.f32 0.00101, %v363_v23  ;;  %v371_v34 = vadd.f32 0.00101, %v365_v27  ;;  %v373_v37 = vadd.f32 0.00101, %v367_v30 }
  0x51   : > { %v370_v33 = vadd.f32 0.00101, %v364_v26  ;;  %v372_v35 = vadd.f32 0.00101, %v366_v28  ;;  %v374_v40 = vadd.f32 0.00101, %v368_v32  ;;  %v406_v55 = vsel %vm388_vm1, %v394_v45, %v400_v46 }
  0x52   : > { %641 = vrcp.f32 %v369_v31  ;;  %v395_v47 = vsub.f32 1.0, %v744_v9  ;;  %v401_v48 = vsub.f32 0.0, %v744_v9  ;;  %v396_v49 = vsub.f32 1.0, %v740_v5 }
  0x53   : > { %643 = vrcp.f32 %v370_v33  ;;  %v402_v50 = vsub.f32 0.0, %v740_v5  ;;  %v397_v51 = vsub.f32 1.0, %v746_v10  ;;  %v403_v52 = vsub.f32 0.0, %v746_v10 }
  0x54   : > { %645 = vrcp.f32 %v371_v34  ;;  %v398_v53 = vsub.f32 1.0, %v742_v6  ;;  %v404_v54 = vsub.f32 0.0, %v742_v6  ;;  %v399_v56 = vsub.f32 1.0, %v748_v11 }
  0x55   : > { %647 = vrcp.f32 %v372_v35  ;;  %v405_v57 = vsub.f32 0.0, %v748_v11  ;;  %v407_v58 = vsel %vm389_vm2, %v395_v47, %v401_v48  ;;  %v408_v60 = vsel %vm390_vm3, %v396_v49, %v402_v50 }
  0x56   : > { %649 = vrcp.f32 %v373_v37  ;;  %v409_v62 = vsel %vm391_vm4, %v397_v51, %v403_v52  ;;  %v412_v63 = vmul.f32 %v406_v55, %v406_v55  ;;  %v410_v1 = vsel %vm392_vm5, %v398_v53, %v404_v54 }
  0x57   : > { %651 = vrcp.f32 %v374_v40  ;;  %v413_v2 = vmul.f32 %v407_v58, %v407_v58  ;;  %v411_v4 = vsel %vm393_vm6, %v399_v56, %v405_v57  ;;  %v414_v5 = vmul.f32 %v408_v60, %v408_v60 }
  0x58   : > { %653 = vlog2.f32 %v369_v31  ;;  %v415_v7 = vmul.f32 %v409_v62, %v409_v62  ;;  %v416_v9 = vmul.f32 %v410_v1, %v410_v1  ;;  %v417_v12 = vmul.f32 %v411_v4, %v411_v4 }
  0x59   : > { %655 = vlog2.f32 %v370_v33 }
  0x5a   : > { %657 = vlog2.f32 %v371_v34 }
  0x5b   : > { %659 = vlog2.f32 %v372_v35 }
  0x5c   : > { %661 = vlog2.f32 %v373_v37 }
  0x5d   : > { %663 = vlog2.f32 %v374_v40 }
  0x5f   : > { %v642_v59 = vpop.eup %641 }
  0x60   : > { %v644_v61 = vpop.eup %643  ;;  %v419_v10 = vmul.f32 %v642_v59, %v412_v63 }
  0x61   : > { %v646_v0 = vpop.eup %645  ;;  %v421_v13 = vmul.f32 %v644_v61, %v413_v2 }
  0x62   : > { %v648_v3 = vpop.eup %647  ;;  %v423_v15 = vmul.f32 %v646_v0, %v414_v5 }
  0x63   : > { %v650_v6 = vpop.eup %649  ;;  %v425_v18 = vmul.f32 %v648_v3, %v415_v7 }
  0x64   : > { %v652_v8 = vpop.eup %651  ;;  %v427_v21 = vmul.f32 %v650_v6, %v416_v9 }
  0x65   : > { %v654_v11 = vpop.eup %653  ;;  %v429_v25 = vmul.f32 %v652_v8, %v417_v12 }
  0x66   : > { %v656_v14 = vpop.eup %655  ;;  %v431_v16 = vmul.f32 0.6931472, %v654_v11 }
  0x67   : > { %v658_v17 = vpop.eup %657  ;;  %v433_v19 = vmul.f32 0.6931472, %v656_v14 }
  0x68   : > { %v660_v20 = vpop.eup %659  ;;  %v435_v22 = vmul.f32 0.6931472, %v658_v17  ;;  %v442_v23 = vadd.f32 %v431_v16, %v419_v10 }
  0x69   : > { %v662_v24 = vpop.eup %661  ;;  %v437_v26 = vmul.f32 0.6931472, %v660_v20  ;;  %v443_v27 = vadd.f32 %v433_v19, %v421_v13 }
  0x6a   : > { %v664_v28 = vpop.eup %663  ;;  %v439_v29 = vmul.f32 0.6931472, %v662_v24  ;;  %v444_v30 = vadd.f32 %v435_v22, %v423_v15 }
  0x6b   : > { %v441_v31 = vmul.f32 0.6931472, %v664_v28  ;;  %v445_v32 = vadd.f32 %v437_v26, %v425_v18 }
  0x6c   : > { %v446_v33 = vadd.f32 %v439_v29, %v427_v21  ;;  %v448_v34 = vadd.f32 %v444_v30, %v442_v23 }
  0x6d   : > { %v447_v35 = vadd.f32 %v441_v31, %v429_v25  ;;  %v457_v36 = vadd.f32 %v445_v32, %v443_v27 }
  0x6e   : > { %v449_v37 = vsel %vm309_vm0, %v446_v33, 0.0 }
  0x6f   : > { %v450_v38 = vadd.f32 %v449_v37, %v448_v34  ;;  %v458_v39 = vsel %vm309_vm0, %v447_v35, 0.0 }
  0x70   : > { %v459_v40 = vadd.f32 %v458_v39, %v457_v36 }
  0x71   : > { %v451_v41 = vrot.slane %v450_v38, 4 }
  0x72   : > { %v460_v42 = vrot.slane %v459_v40, 4 }
  0x73   : > { %v452_v43 = vadd.f32 %v451_v41, %v450_v38 }
  0x74   : > { %v461_v44 = vadd.f32 %v460_v42, %v459_v40 }
  0x75   : > { %v453_v45 = vrot.slane %v452_v43, 2 }
  0x76   : > { %v462_v46 = vrot.slane %v461_v44, 2 }
  0x77   : > { %v454_v47 = vadd.f32 %v453_v45, %v452_v43 }
  0x78   : > { %v463_v48 = vadd.f32 %v462_v46, %v461_v44 }
  0x79   : > { %v455_v49 = vrot.slane %v454_v47, 1 }
  0x7a   : > { %v464_v50 = vrot.slane %v463_v48, 1 }
  0x7b   : > { %v456_v51 = vadd.f32 %v455_v49, %v454_v47 }
  0x7c   : > { %v465_v52 = vadd.f32 %v464_v50, %v463_v48 }
  0x7e   : > { %v466_v53 = vadd.f32 %v465_v52, %v456_v51 }
  0x80   : > { %467 = vst [vmem:[%s271_s29] sm:$0x1] %v466_v53 }
  0x81 PF: > { %s13_s14 = sadd.s32 1, %s687_s14   ;;  %s801_s12 = smov %s683_s13 }
  0x82   : > { %p10_p5 = scmp.ge.s32.totalorder %s13_s14, 4   ;;  %s802_s13 = smov %s804_s15 }
  0x84   :  { %12 = sbr.rel (!%p10_p5) target bundleno = 2 (0x2), region = 68 }

</bundles_post_ra>
